<compile_context>
chip_gen: v6e
topology: v6e:2x2x1
jax: 0.10.0
libtpu: 0.0.40
codegen_flags: <defaults>
</compile_context>

<pallas_src>
import math
import functools

import jax
import jax.numpy as jnp
import numpy as np
from jax import lax
from jax.experimental import pallas as pl
from jax.experimental.pallas import tpu as pltpu


def _round_up(x, m):
    return ((x + m - 1) // m) * m


def _gelu_exact(x):
    # torch.nn.functional.gelu default = exact erf-based GELU.
    return 0.5 * x * (1.0 + lax.erf(x * (1.0 / math.sqrt(2.0))))


def mlm_head_kernel(x_ref, wd_ref, bd_ref, gamma_ref, beta_ref,
                    wdec_ref, bdec_ref, out_ref, h_scratch, *, eps):
    # grid = (row tile i, vocab tile j).  The transform only depends on i:
    # compute it at j == 0, store it (already cast to the matmul dtype) in VMEM
    # scratch, and reuse it for every vocab tile of this row tile.
    @pl.when(pl.program_id(1) == 0)
    def _():
        x = x_ref[...]
        h = jnp.dot(x.astype(wd_ref.dtype), wd_ref[...],
                    preferred_element_type=jnp.float32) + bd_ref[...]
        h = _gelu_exact(h)
        mu = jnp.mean(h, axis=-1, keepdims=True)
        var = jnp.mean(jnp.square(h - mu), axis=-1, keepdims=True)
        normed = (h - mu) * lax.rsqrt(var + eps)
        h_scratch[...] = (normed * gamma_ref[...] + beta_ref[...]).astype(h_scratch.dtype)

    # Vocab projection for this (tm, tv) output tile (MXU, f32 accumulation).
    # No casts on this hot path: weights and scratch are already matmul_dtype.
    logits = jnp.dot(h_scratch[...], wdec_ref[...],
                     preferred_element_type=jnp.float32) + bdec_ref[...]
    out_ref[...] = logits.astype(out_ref.dtype)


def prepare_mlm_head_params(params, *, matmul_dtype=jnp.float32, tile_v=512):
    """One-time parameter prep, hoisted out of the per-call path.

    Transposes nn.Linear weights (out,in)->(in,out), pre-casts them to
    `matmul_dtype` (so the HBM weight stream is already bf16 when requested),
    and pads the vocab dimension to a multiple of the 128-aligned vocab tile.
    """
    H = params["dense_w"].shape[0]
    V = params["decoder_w"].shape[0]

    tv = min(int(tile_v), _round_up(V, 128))
    tv = _round_up(tv, 128)
    v_pad = _round_up(V, tv)

    wd_t = params["dense_w"].T.astype(matmul_dtype)       # (H, H)
    wdec_t = params["decoder_w"].T.astype(matmul_dtype)   # (H, V)
    bdec = params["decoder_b"].astype(jnp.float32)
    if v_pad != V:
        wdec_t = jnp.pad(wdec_t, ((0, 0), (0, v_pad - V)))
        bdec = jnp.pad(bdec, (0, v_pad - V))

    return dict(
        wd_t=wd_t,
        bd=params["dense_b"].reshape(1, H).astype(jnp.float32),
        gamma=params["ln_gamma"].reshape(1, H).astype(jnp.float32),
        beta=params["ln_beta"].reshape(1, H).astype(jnp.float32),
        wdec_t=wdec_t,
        bdec=bdec.reshape(1, v_pad),
        H=H, V=V, V_pad=v_pad, tv=tv,
        matmul_dtype=jnp.dtype(matmul_dtype),
    )


def bert_mlm_head(sequence_output, prep, *, eps=1e-12, out_dtype=jnp.float32,
                  tile_m=512, vmem_budget_bytes=40 * 1024 * 1024):
    """sequence_output: (B, S, H) -> prediction scores (B, S, V) in out_dtype."""
    B, S, H = sequence_output.shape
    assert H == prep["H"], "hidden size mismatch with prepared params"
    V, v_pad, tv = prep["V"], prep["V_pad"], prep["tv"]
    mm_dtype = prep["matmul_dtype"]
    M = B * S

    x2d = sequence_output.reshape(M, H)
    x_bytes = x2d.dtype.itemsize
    w_bytes = mm_dtype.itemsize
    o_bytes = jnp.dtype(out_dtype).itemsize

    # Row tile: as large as the VMEM budget allows — the full H*V decoder weight
    # is re-streamed from HBM once per row tile, so bigger tm directly cuts the
    # dominant HBM traffic.
    tm = min(_round_up(int(tile_m), 8), _round_up(M, 8))

    def vmem_bytes(tm_, tv_):
        return (2 * tm_ * H * x_bytes          # x tiles (double-buffered)
                + 2 * H * H * w_bytes          # dense W^T (grid-invariant)
                + 2 * H * tv_ * w_bytes        # decoder W^T tiles
                + 2 * tm_ * tv_ * o_bytes      # output tiles
                + tm_ * H * w_bytes            # transformed-hidden scratch
                + 2 * 4 * (tv_ + 3 * H))       # bias / gamma / beta vectors

    # Shrink tv first (keeps the big-tm amortization win), then tm.
    while vmem_bytes(tm, tv) > vmem_budget_bytes and tv > 128:
        tv //= 2
    while vmem_bytes(tm, tv) > vmem_budget_bytes and tm > 8:
        tm = max(8, _round_up(tm // 2, 8))
    # NOTE: on v7x (2 TensorCores/chip) also keep M/tm >= 2 so both cores get
    # row tiles via the "parallel" axis; at demo shapes this is moot.

    m_pad = _round_up(M, tm)
    assert v_pad % tv == 0 and m_pad % tm == 0
    if m_pad != M:
        x2d = jnp.pad(x2d, ((0, m_pad - M), (0, 0)))

    grid = (m_pad // tm, v_pad // tv)

    cost = pl.CostEstimate(
        flops=2 * m_pad * H * (H + v_pad),
        transcendentals=m_pad * H,                           # erf in GELU
        bytes_accessed=int(m_pad * H * x_bytes
                           + H * H * w_bytes
                           + grid[0] * H * v_pad * w_bytes   # weight re-stream
                           + m_pad * v_pad * o_bytes),
    )

    kernel = functools.partial(mlm_head_kernel, eps=eps)

    out2d = pl.pallas_call(
        kernel,
        out_shape=jax.ShapeDtypeStruct((m_pad, v_pad), out_dtype),
        grid_spec=pltpu.PrefetchScalarGridSpec(
            num_scalar_prefetch=0,
            grid=grid,
            in_specs=[
                pl.BlockSpec((tm, H), lambda i, j: (i, 0)),    # hidden rows
                pl.BlockSpec((H, H), lambda i, j: (0, 0)),     # dense W^T (const)
                pl.BlockSpec((1, H), lambda i, j: (0, 0)),     # dense bias
                pl.BlockSpec((1, H), lambda i, j: (0, 0)),     # LN gamma
                pl.BlockSpec((1, H), lambda i, j: (0, 0)),     # LN beta
                pl.BlockSpec((H, tv), lambda i, j: (0, j)),    # decoder W^T tile
                pl.BlockSpec((1, tv), lambda i, j: (0, j)),    # decoder bias tile
            ],
            out_specs=pl.BlockSpec((tm, tv), lambda i, j: (i, j)),
            scratch_shapes=[pltpu.VMEM((tm, H), mm_dtype)],    # transformed hidden
        ),
        compiler_params=pltpu.CompilerParams(
            dimension_semantics=("parallel", "arbitrary"),
            # Explicit limit, safe on every generation (v7x physical VMEM is
            # 64 MiB); pass a larger budget on v5e/v6e (128 MiB) for bigger tiles.
            vmem_limit_bytes=int(min(64 * 1024 * 1024,
                                     max(32 * 1024 * 1024,
                                         2 * vmem_bytes(tm, tv)))),
        ),
        cost_estimate=cost,
    )(x2d, prep["wd_t"], prep["bd"], prep["gamma"], prep["beta"],
      prep["wdec_t"], prep["bdec"])

    return out2d[:M, :V].reshape(B, S, V)


def reference_jax(sequence_output, params, *, eps=1e-12):
    """Plain-JAX reference mirroring the PyTorch forward (eval mode)."""
    x = sequence_output
    h = x @ params["dense_w"].T + params["dense_b"]
    h = 0.5 * h * (1.0 + lax.erf(h / math.sqrt(2.0)))
    mu = jnp.mean(h, axis=-1, keepdims=True)
    var = jnp.mean((h - mu) ** 2, axis=-1, keepdims=True)
    h = (h - mu) / jnp.sqrt(var + eps) * params["ln_gamma"] + params["ln_beta"]
    return h @ params["decoder_w"].T + params["decoder_b"]


if __name__ == "__main__":
    # Small shapes consistent with the module: batch=2, seq=8, hidden=32.
    # Vocab deliberately NOT a multiple of 128 (1000) to exercise vocab padding.
    B, S, H, V = 2, 8, 32, 1000

    key = jax.random.PRNGKey(0)
    keys = jax.random.split(key, 8)
    init = lambda k, shape: (0.02 * jax.random.normal(k, shape)).astype(jnp.float32)

    params = {
        "dense_w": init(keys[0], (H, H)),
        "dense_b": init(keys[1], (H,)),
        "ln_gamma": jnp.ones((H,), jnp.float32),
        "ln_beta": jnp.zeros((H,), jnp.float32),
        "decoder_w": init(keys[2], (V, H)),
        "decoder_b": jnp.zeros((V,), jnp.float32),   # self.bias starts at zeros
    }

    sequence_output = jax.random.normal(keys[3], (B, S, H), dtype=jnp.float32)
    ref = reference_jax(sequence_output, params)

    # 1) Strict-numerics config (f32 weight stream) vs the reference.
    prep_f32 = prepare_mlm_head_params(params, matmul_dtype=jnp.float32)
    out_f32 = jax.block_until_ready(bert_mlm_head(sequence_output, prep_f32))
    np.testing.assert_allclose(np.asarray(out_f32), np.asarray(ref),
                               atol=1e-4, rtol=1e-4)

    # 2) Production-perf config: bf16 weight stream + bf16 scratch (the numerics
    #    change is documented in the review; validated here at loose tolerance).
    prep_bf16 = prepare_mlm_head_params(params, matmul_dtype=jnp.bfloat16)
    out_bf16 = jax.block_until_ready(bert_mlm_head(sequence_output, prep_bf16))
    np.testing.assert_allclose(np.asarray(out_bf16), np.asarray(ref),
                               atol=2e-2, rtol=2e-2)

    print("KERNEL_OK")
</pallas_src>

<mosaic_0001>
module attributes {stable_mosaic.version = 11 : i64} {
  func.func @mlm_head_kernel(%arg0: i32, %arg1: i32, %arg2: memref<16x32xf32, #tpu.memory_space<vmem>>, %arg3: memref<32x32xf32, #tpu.memory_space<vmem>>, %arg4: memref<1x32xf32, #tpu.memory_space<vmem>>, %arg5: memref<1x32xf32, #tpu.memory_space<vmem>>, %arg6: memref<1x32xf32, #tpu.memory_space<vmem>>, %arg7: memref<32x512xf32, #tpu.memory_space<vmem>>, %arg8: memref<1x512xf32, #tpu.memory_space<vmem>>, %arg9: memref<16x512xf32, #tpu.memory_space<vmem>>, %arg10: memref<16x32xf32, #tpu.memory_space<vmem>>) attributes {dimension_semantics = [#tpu.dimension_semantics<parallel>, #tpu.dimension_semantics<arbitrary>], iteration_bounds = array<i64: 1, 2>, scalar_prefetch = 0 : i64, scratch_operands = 1 : i64, tpu.core_type = #tpu.core_type<tc>, window_params = [{transform_indices = @transform_0, window_bounds = array<i64: 16, 32>}, {pipeline_mode = #tpu.pipeline_mode<synchronous>, transform_indices = @transform_1, window_bounds = array<i64: 32, 32>}, {pipeline_mode = #tpu.pipeline_mode<synchronous>, transform_indices = @transform_2, window_bounds = array<i64: 1, 32>}, {pipeline_mode = #tpu.pipeline_mode<synchronous>, transform_indices = @transform_3, window_bounds = array<i64: 1, 32>}, {pipeline_mode = #tpu.pipeline_mode<synchronous>, transform_indices = @transform_4, window_bounds = array<i64: 1, 32>}, {transform_indices = @transform_5, window_bounds = array<i64: 32, 512>}, {transform_indices = @transform_6, window_bounds = array<i64: 1, 512>}, {transform_indices = @transform_7, window_bounds = array<i64: 16, 512>}]} {
    %c0_i32 = arith.constant 0 : i32
    %0 = arith.cmpi eq, %arg1, %c0_i32 : i32
    %1 = arith.extui %0 : i1 to i32
    %c0_i32_0 = arith.constant 0 : i32
    %2 = arith.cmpi ne, %1, %c0_i32_0 : i32
    scf.if %2 {
      %c0_8 = arith.constant 0 : index
      %c0_9 = arith.constant 0 : index
      %10 = vector.load %arg2[%c0_8, %c0_9] : memref<16x32xf32, #tpu.memory_space<vmem>>, vector<16x32xf32>
      %c0_10 = arith.constant 0 : index
      %c0_11 = arith.constant 0 : index
      %11 = vector.load %arg3[%c0_10, %c0_11] : memref<32x32xf32, #tpu.memory_space<vmem>>, vector<32x32xf32>
      %cst_12 = arith.constant dense<0.000000e+00> : vector<16x32xf32>
      %12 = tpu.matmul %10, %11, %cst_12 {dimension_numbers = #tpu.dot_dimension_numbers<[1], [0], [0], [1], [0, 0, 1, 1], [], []>} : vector<16x32xf32>, vector<32x32xf32>, vector<16x32xf32> -> vector<16x32xf32>
      %c0_13 = arith.constant 0 : index
      %c0_14 = arith.constant 0 : index
      %13 = vector.load %arg4[%c0_13, %c0_14] : memref<1x32xf32, #tpu.memory_space<vmem>>, vector<1x32xf32>
      %14 = vector.broadcast %13 : vector<1x32xf32> to vector<16x32xf32>
      %15 = arith.addf %12, %14 : vector<16x32xf32>
      %cst_15 = arith.constant 5.000000e-01 : f32
      %16 = vector.broadcast %cst_15 : f32 to vector<16x32xf32>
      %17 = arith.mulf %16, %15 : vector<16x32xf32>
      %cst_16 = arith.constant 0.707106769 : f32
      %18 = vector.broadcast %cst_16 : f32 to vector<16x32xf32>
      %19 = arith.mulf %15, %18 : vector<16x32xf32>
      %20 = math.erf %19 : vector<16x32xf32>
      %cst_17 = arith.constant 1.000000e+00 : f32
      %21 = vector.broadcast %cst_17 : f32 to vector<16x32xf32>
      %22 = arith.addf %21, %20 : vector<16x32xf32>
      %23 = arith.mulf %17, %22 : vector<16x32xf32>
      %cst_18 = arith.constant dense<0.000000e+00> : vector<16xf32>
      %24 = vector.multi_reduction <add>, %23, %cst_18 [1] : vector<16x32xf32> to vector<16xf32>
      %25 = vector.shape_cast %24 : vector<16xf32> to vector<16x1xf32>
      %cst_19 = arith.constant 3.200000e+01 : f32
      %26 = vector.broadcast %cst_19 : f32 to vector<16x1xf32>
      %27 = arith.divf %25, %26 : vector<16x1xf32>
      %28 = vector.broadcast %27 : vector<16x1xf32> to vector<16x32xf32>
      %29 = arith.subf %23, %28 : vector<16x32xf32>
      %30 = arith.mulf %29, %29 : vector<16x32xf32>
      %cst_20 = arith.constant dense<0.000000e+00> : vector<16xf32>
      %31 = vector.multi_reduction <add>, %30, %cst_20 [1] : vector<16x32xf32> to vector<16xf32>
      %32 = vector.shape_cast %31 : vector<16xf32> to vector<16x1xf32>
      %cst_21 = arith.constant 3.200000e+01 : f32
      %33 = vector.broadcast %cst_21 : f32 to vector<16x1xf32>
      %34 = arith.divf %32, %33 : vector<16x1xf32>
      %35 = vector.broadcast %27 : vector<16x1xf32> to vector<16x32xf32>
      %36 = arith.subf %23, %35 : vector<16x32xf32>
      %cst_22 = arith.constant 9.99999996E-13 : f32
      %37 = vector.broadcast %cst_22 : f32 to vector<16x1xf32>
      %38 = arith.addf %34, %37 : vector<16x1xf32>
      %39 = math.rsqrt %38 : vector<16x1xf32>
      %40 = vector.broadcast %39 : vector<16x1xf32> to vector<16x32xf32>
      %41 = arith.mulf %36, %40 : vector<16x32xf32>
      %c0_23 = arith.constant 0 : index
      %c0_24 = arith.constant 0 : index
      %42 = vector.load %arg5[%c0_23, %c0_24] : memref<1x32xf32, #tpu.memory_space<vmem>>, vector<1x32xf32>
      %43 = vector.broadcast %42 : vector<1x32xf32> to vector<16x32xf32>
      %44 = arith.mulf %41, %43 : vector<16x32xf32>
      %c0_25 = arith.constant 0 : index
      %c0_26 = arith.constant 0 : index
      %45 = vector.load %arg6[%c0_25, %c0_26] : memref<1x32xf32, #tpu.memory_space<vmem>>, vector<1x32xf32>
      %46 = vector.broadcast %45 : vector<1x32xf32> to vector<16x32xf32>
      %47 = arith.addf %44, %46 : vector<16x32xf32>
      %c0_27 = arith.constant 0 : index
      %c0_28 = arith.constant 0 : index
      %48 = vector.load %arg10[%c0_27, %c0_28] : memref<16x32xf32, #tpu.memory_space<vmem>>, vector<16x32xf32>
      tpu.vector_store %arg10[%c0_27, %c0_28], %47 {strides = array<i32>} : memref<16x32xf32, #tpu.memory_space<vmem>>, vector<16x32xf32>,
    } else {
    }
    %c0 = arith.constant 0 : index
    %c0_1 = arith.constant 0 : index
    %3 = vector.load %arg10[%c0, %c0_1] : memref<16x32xf32, #tpu.memory_space<vmem>>, vector<16x32xf32>
    %c0_2 = arith.constant 0 : index
    %c0_3 = arith.constant 0 : index
    %4 = vector.load %arg7[%c0_2, %c0_3] : memref<32x512xf32, #tpu.memory_space<vmem>>, vector<32x512xf32>
    %cst = arith.constant dense<0.000000e+00> : vector<16x512xf32>
    %5 = tpu.matmul %3, %4, %cst {dimension_numbers = #tpu.dot_dimension_numbers<[1], [0], [0], [1], [0, 0, 1, 1], [], []>} : vector<16x32xf32>, vector<32x512xf32>, vector<16x512xf32> -> vector<16x512xf32>
    %c0_4 = arith.constant 0 : index
    %c0_5 = arith.constant 0 : index
    %6 = vector.load %arg8[%c0_4, %c0_5] : memref<1x512xf32, #tpu.memory_space<vmem>>, vector<1x512xf32>
    %7 = vector.broadcast %6 : vector<1x512xf32> to vector<16x512xf32>
    %8 = arith.addf %5, %7 : vector<16x512xf32>
    %c0_6 = arith.constant 0 : index
    %c0_7 = arith.constant 0 : index
    %9 = vector.load %arg9[%c0_6, %c0_7] : memref<16x512xf32, #tpu.memory_space<vmem>>, vector<16x512xf32>
    tpu.vector_store %arg9[%c0_6, %c0_7], %8 {strides = array<i32>} : memref<16x512xf32, #tpu.memory_space<vmem>>, vector<16x512xf32>,
    return
  }
  func.func @transform_0(%arg0: i32, %arg1: i32) -> (i32, i32) {
    %c0_i32 = arith.constant 0 : i32
    %c0_i32_0 = arith.constant 0 : i32
    return %arg0, %c0_i32 : i32, i32
  }
  func.func @transform_1(%arg0: i32, %arg1: i32) -> (i32, i32) {
    %c0_i32 = arith.constant 0 : i32
    %c0_i32_0 = arith.constant 0 : i32
    %c0_i32_1 = arith.constant 0 : i32
    return %c0_i32, %c0_i32_0 : i32, i32
  }
  func.func @transform_2(%arg0: i32, %arg1: i32) -> (i32, i32) {
    %c0_i32 = arith.constant 0 : i32
    %c0_i32_0 = arith.constant 0 : i32
    %c0_i32_1 = arith.constant 0 : i32
    return %c0_i32, %c0_i32_0 : i32, i32
  }
  func.func @transform_3(%arg0: i32, %arg1: i32) -> (i32, i32) {
    %c0_i32 = arith.constant 0 : i32
    %c0_i32_0 = arith.constant 0 : i32
    %c0_i32_1 = arith.constant 0 : i32
    return %c0_i32, %c0_i32_0 : i32, i32
  }
  func.func @transform_4(%arg0: i32, %arg1: i32) -> (i32, i32) {
    %c0_i32 = arith.constant 0 : i32
    %c0_i32_0 = arith.constant 0 : i32
    %c0_i32_1 = arith.constant 0 : i32
    return %c0_i32, %c0_i32_0 : i32, i32
  }
  func.func @transform_5(%arg0: i32, %arg1: i32) -> (i32, i32) {
    %c0_i32 = arith.constant 0 : i32
    %c0_i32_0 = arith.constant 0 : i32
    return %c0_i32, %arg1 : i32, i32
  }
  func.func @transform_6(%arg0: i32, %arg1: i32) -> (i32, i32) {
    %c0_i32 = arith.constant 0 : i32
    %c0_i32_0 = arith.constant 0 : i32
    return %c0_i32, %arg1 : i32, i32
  }
  func.func @transform_7(%arg0: i32, %arg1: i32) -> (i32, i32) {
    %c0_i32 = arith.constant 0 : i32
    return %arg0, %arg1 : i32, i32
  }
}

</mosaic_0001>

<bundles_post_ra>
// kernel: tpu_custom_call.1
= control target key start
LH: loop header
LB: loop body
LE: loop exit
PB: predicated region body
PF: predicated region fallthrough
CT: control target
= control target key end

     0   :  { %s1558_s0 = inlined_call_operand.hbm [shape: f32[16,32], index: 0, kind: input, shape index: {}]   ;;  %s1559_s1 = inlined_call_operand.hbm [shape: f32[32,32], index: 1, kind: input, shape index: {}]   ;;  %s1560_s2 = inlined_call_operand.vmem [shape: f32[1,32], index: 2, kind: input, shape index: {}]   ;;  %s1561_s3 = inlined_call_operand.vmem [shape: f32[1,32], index: 3, kind: input, shape index: {}]   ;;  %s1562_s4 = inlined_call_operand.hbm [shape: f32[1,32], index: 4, kind: input, shape index: {}]   ;;  %s1563_s5 = inlined_call_operand.hbm [shape: f32[32,1024], index: 5, kind: input, shape index: {}]   ;;  %s1564_s6 = inlined_call_operand.vmem [shape: f32[1,1024], index: 6, kind: input, shape index: {}]   ;;  %s1565_s7 = inlined_call_operand.hbm [shape: f32[16,1024], index: 7, kind: output, shape index: {}]  }
   0x1   :  { %1572 = sst [smem:[#allocation19_spill]] %s1558_s0 }
   0x2   :  { %1573 = sst [smem:[#allocation20_spill]] %s1559_s1 }
   0x3   :  { %1574 = sst [smem:[#allocation21_spill]] %s1562_s4 }
   0x4   :  { %12 = vsyncpa [#allocation4], 0 }
   0x5   :  { %13 = vsyncpa [#allocation7], 0 }
   0x6   :  { %14 = vsyncpa [#allocation10], 0 }
   0x7   :  { %16 = vsyncpa [#allocation10 + $0x1], 0 }
   0x8   :  { %17 = vsyncpa [#allocation5], 0 }
   0x9   :  { %19 = vsyncpa [#allocation5 + $0x1], 0  ;;  %s1303_s24 = smov 0   ;;  %s1305_s25 = smov 0  }
   0xa   :  { %s1307_s26 = smov 0   ;;  %s1309_s27 = smov 0  }
   0xb   :  { %s1311_s28 = smov 0   ;;  %s1313_s29 = smov 0  }
   0xc LB: > { %1575 = sst [smem:[#allocation16_spill]] %s1247_s29  ;;  %s892_s30 = sadd.s32 4294967295, %s1247_s29   ;;  %s1247_s29 = sphi %s1313_s29, %s25_s29   ;;  %s1243_s28 = sphi %s1311_s28, %s1600_s28   ;;  %s1239_s27 = sphi %s1309_s27, %s1599_s27   ;;  %s1235_s26 = sphi %s1307_s26, %s1598_s26   ;;  %s1231_s25 = sphi %s1305_s25, %s1597_s25   ;;  %s1227_s24 = sphi %s1303_s24, %s1596_s24  }
   0xd   : > { %s893_s8 = sadd.s32 4294967294, %s1247_s29   ;;  %p161_p0 = scmp.ne.s32.totalorder %s1235_s26, %s1231_s25 }
   0xe   : > { %p162_p1 = scmp.eq.s32.totalorder %s1247_s29, 0  ;;  %p167_p2 = scmp.ne.s32.totalorder %s1231_s25, %s1227_s24 }
   0xf   : > { %p1340_p3 = scmp.eq.s32.totalorder %s892_s30, 0  ;;  %p219_p5 = scmp.eq.s32.totalorder %s892_s30, 1 }
  0x10   : > { %p1344_p4 = por %p162_p1, %p161_p0  ;;  %p225_p7 = scmp.eq.s32.totalorder %s893_s8, 1 }
  0x11   : > { %p1350_p6 = por %p1340_p3, %p167_p2  ;;  %p1354_p8 = por %p219_p5, %p161_p0 }
  0x12   : > { %p894_p9 = scmp.ge.s32.totalorder %s1247_s29, 1  ;;  %p1359_p10 = por %p225_p7, %p167_p2 }
  0x13   : > { %s1578_s11 = scalar_select %p1350_p6, 1, 0 }
  0x14   : > { %s1579_s12 = scalar_select %p1354_p8, 1, 0 }
  0x15   : > { %s1580_s13 = scalar_select %p1359_p10, 1, 0 }
  0x16   : > { %p232_p11 = scmp.lt.s32.totalorder %s1247_s29, 3  ;;  %s1249_s15 = smov [#allocation6]  }
  0x17   : > { %1581 = sst [smem:[#allocation17_spill]] %s1580_s13  ;;  %s260_s16 = sshll.u32 %s1249_s15, 4  ;;  %s261_s16 = int_to_ptr.vmem [resolvable:$true] %s260_s16 }
  0x18   : > { %p1364_p12 = pnand %p894_p9, %p232_p11  ;;  %p980_p0 = scmp.lt.s32.totalorder %s1247_s29, 2 }
  0x19   : > { %s1064_s19 = scalar_lea.vmem %s261_s16, 512  ;;  %p1072_p10 = scmp.lt.s32.totalorder %s261_s16, %s261_s16 }
  0x1a   : > { %p959_p1 = pneg %p1364_p12  ;;  %p1380_p2 = pnand %p980_p0, %p1344_p4 }
  0x1b   : > { %p1065_p9 = scmp.ne.s32.totalorder %s261_s16, %s1064_s19 }
  0x1c   : > { %p1374_p5 = pnand %p959_p1, %p1340_p3  ;;  %p1073_p1 = scmp.lt.s32.totalorder %s1064_s19, %s1064_s19 }
  0x1e   : > { %p1055_p7 = pneg %p1374_p5  ;;  %p1074_p8 = por %p1073_p1, %p1072_p10 }
  0x20   : > { %p1067_p11 = pnand %p1065_p9, %p1055_p7 }
  0x22   : > { %p1068_p13 = pneg %p1067_p11 }
  0x24   : > { %p1075_p6 = pnand %p1074_p8, %p1068_p13 }
  0x26   : > { %1078 = shalt.err (!%p1075_p6)
}
  0x27   : > { %s1250_s20 = smov 128   ;;  %s1251_s21 = smov 8  }
  0x28   : > { %s1585_s1 = sld [smem:[#allocation20_spill]]  ;;  %s1252_s30 = smov [#allocation3]  }
  0x29   : > { %s247_s8 = sshll.u32 %s1252_s30, 4  ;;  %s248_s8 = int_to_ptr.vmem [resolvable:$true] %s247_s8 }
  0x2a   : > { %s1090_s10 = scalar_lea.vmem %s248_s8, 256  ;;  %p1098_p8 = scmp.lt.s32.totalorder %s248_s8, %s248_s8 }
  0x2b   : > { %p1091_p4 = scmp.ne.s32.totalorder %s248_s8, %s1090_s10  ;;  %p1099_p6 = scmp.lt.s32.totalorder %s1090_s10, %s1090_s10 }
  0x2d   : > { %p1093_p0 = pnand %p1091_p4, %p1055_p7  ;;  %p1100_p13 = por %p1099_p6, %p1098_p8 }
  0x2e   : > { %965 = dma.hbm_to_vmem [thread:$0]  (!%p1374_p5), %s1585_s1, 512, %s261_s16, [#allocation7], %s1250_s20, %s1250_s20, %s1251_s21  }
  0x2f   : > { %p1094_p10 = pneg %p1093_p0 }
  0x31   : > { %p1101_p9 = pnand %p1100_p13, %p1094_p10 }
  0x33   : > { %1104 = shalt.err (!%p1101_p9)
}
  0x34   : > { %s1586_s0 = sld [smem:[#allocation19_spill]]  ;;  %s1253_s16 = smov [#allocation8]  }
  0x35   : > { %s280_s22 = sshll.u32 %s1253_s16, 4  ;;  %s281_s22 = int_to_ptr.vmem [resolvable:$true] %s280_s22 }
  0x36   : > { %s1116_s23 = scalar_lea.vmem %s281_s22, 16  ;;  %s1123_s30 = scalar_lea.vmem %s281_s22, 32 }
  0x37   : > { %p1117_p11 = scmp.ne.s32.totalorder %s281_s22, %s1116_s23  ;;  %p1124_p0 = scmp.lt.s32.totalorder %s281_s22, %s281_s22 }
  0x38   : > { %p1125_p10 = scmp.lt.s32.totalorder %s1123_s30, %s1116_s23 }
  0x39   : > { %p1119_p1 = pnand %p1117_p11, %p1055_p7 }
  0x3a   : > { %962 = dma.hbm_to_vmem [thread:$0]  (!%p1374_p5), %s1586_s0, 256, %s248_s8, [#allocation4], %s1250_s20, %s1250_s20, %s1251_s21  }
  0x3b   : > { %p1120_p4 = pneg %p1119_p1  ;;  %p1126_p8 = por %p1125_p10, %p1124_p0 }
  0x3d   : > { %p1127_p6 = pnand %p1126_p8, %p1120_p4 }
  0x3f   : > { %1130 = shalt.err (!%p1127_p6)
}
  0x40   : > { %s1587_s4 = sld [smem:[#allocation21_spill]]  ;;  %s34_s20 = sadd.s32 1, %s1243_s28 }
  0x41   : > { %s154_s21 = sadd.s32 1, %s1235_s26  ;;  %p35_p7 = scmp.ge.s32.totalorder %s34_s20, 2 }
  0x42   : > { %s291_s8 = sand.u32 1, %s1235_s26   ;;  %s924_s17 = sshll.u32 %s1243_s28, 9 }
  0x43   : > { %s899_s19 = sshll.u32 %s291_s8, 7  ;;  %s1602_s20 = smov (%p35_p7, %s34_s20), 0 }
  0x44   : > { %1588 = sst [smem:[#allocation18_spill]] %s1602_s20  ;;  %s151_s16 = ssub.s32 %s1243_s28, %s1602_s20 }
  0x45   : > { %s301_s10 = scalar_lea.hbm %s1563_s5, %s924_s17  ;;  %p152_p13 = scmp.eq.s32.totalorder %s151_s16, 0 }
  0x46   : > { %968 = dma.hbm_to_vmem [thread:$0]  (!%p1374_p5), %s1587_s4, 16, %s281_s22, [#allocation7]  }
  0x47   : > { %s295_s15 = scalar_lea.vmem [#allocation9], %s899_s19  ;;  %s292_s1 = scalar_lea.sflag [#allocation10], %s291_s8 }
  0x48   : > { %s302_s0 = sshll.u32 %s295_s15, 4  ;;  %p1133_p5 = pneg %p1380_p2  ;;  %s303_s0 = int_to_ptr.vmem [resolvable:$true] %s302_s0 }
  0x49   : > { %s1422_s22 = scalar_select %p152_p13, %s1235_s26, %s154_s21  }
  0x4a   : > { %s1144_s4 = scalar_lea.vmem %s303_s0, 2048  ;;  %s1254_s29 = smov [#allocation9]  }
  0x4b   : > { %p1145_p9 = scmp.ne.s32.totalorder %s303_s0, %s1144_s4  ;;  %s1149_s13 = sshll.u32 %s1254_s29, 4  ;;  %s1150_s13 = int_to_ptr.vmem [resolvable:$false] %s1149_s13 }
  0x4c   : > { %s1151_s20 = scalar_lea.vmem %s1150_s13, 4096  ;;  %p1152_p4 = scmp.lt.s32.totalorder %s303_s0, %s1150_s13 }
  0x4d   : > { %p1147_p11 = pnand %p1145_p9, %p1133_p5  ;;  %p1153_p0 = scmp.lt.s32.totalorder %s1151_s20, %s1144_s4 }
  0x4f   : > { %p1148_p1 = pneg %p1147_p11  ;;  %p1154_p10 = por %p1153_p0, %p1152_p4 }
  0x51   : > { %p1155_p8 = pnand %p1154_p10, %p1148_p1 }
  0x53   : > { %1158 = shalt.err (!%p1155_p8)
}
  0x54   : > { %s1255_s19 = smov 1024   ;;  %s1256_s21 = smov 512  }
  0x55   : > { %s1257_s17 = smov 32   ;;  %322 = sbr.rel (%p1364_p12) target bundleno = 871 (0x367), region = 48 }
  0x56   : > { %972 = dma.hbm_to_vmem [thread:$0]  (!%p1380_p2), %s301_s10, 2048, %s303_s0, %s292_s1, %s1255_s19, %s1256_s21, %s1257_s17  }
  0x5a   : > { %1210 = dma.done.wait (%p1340_p3), [#allocation4], 256  }
  0x5b   : > { %1212 = vsyncadd (%p1340_p3), [#allocation4], 4294967040 }
  0x5c   : > { %1214 = dma.done.wait (%p1340_p3), [#allocation7], 528  }
  0x5d   : > { %1216 = vsyncadd (%p1340_p3), [#allocation7], 4294966768  ;;  %s1439_s4 = sand.u32 1, %s1231_s25   ;;  %p1589_p12 = scmp.ne.s32.totalorder %s1578_s11, 0 }
  0x5e   : > { %s906_s0 = sshll.u32 %s1439_s4, 7  ;;  %s337_s1 = scalar_lea.sflag [#allocation10], %s1439_s4 }
  0x5f   : > { %s1443_s29 = scalar_lea.vmem [#allocation9], %s906_s0 }
  0x60   : > { %1218 = dma.done.wait (%p1589_p12), %s337_s1, 2048  }
  0x61   : > { %1220 = vsyncadd (%p1589_p12), %s337_s1, 4294965248  ;;  %s907_s13 = sshll.u32 %s1439_s4, 6  ;;  %s908_s9 = sshll.u32 %s1239_s27, 2 }
  0x62   : > { %p378_p3 = scmp.lt.s32.totalorder %s908_s9, 7  ;;  %s1457_s8 = scalar_lea.vmem [#allocation11], %s907_s13 }
  0x63   : > { %p909_p2 = scmp.ne.s32.totalorder %s1239_s27, 0 }
  0x64   : > { %s1604_s9 = smov (!%p378_p3, %s908_s9), 7 }
  0x65   : > { %s380_s20 = scalar_lea.vmem %s1564_s6, %s1604_s9  ;;  %387 = sbr.rel (%p909_p2) target bundleno = 645 (0x285), region = 68 }
  0x6a   : > { %v393_v0 = vld [vmem:[#allocation6 + $0x18] sm:$0xff]  ;;  %v392_v1 = vld [vmem:[#allocation6 + $0x10] sm:$0xff]  ;;  %vm401_vm0 = vcmask 261120   ;;  %v391_v3 = vld [vmem:[#allocation6 + $0x8] sm:$0xff] }
  0x6b   : > { %932 = vmatprep.subr.mxu0 %v393_v0  ;;  %v388_v2 = vld [vmem:[#allocation3] sm:$0xff]  ;;  %v390_v4 = vld [vmem:[#allocation6] sm:$0xff]  ;;  %v389_v5 = vld [vmem:[#allocation3 + $0x8] sm:$0xff] }
  0x6c   : > { %933 = vmatpush3.msra.mxu0 %v393_v0  ;;  %940 = vmatprep.mubr.msk.f32.mxu0 %vm401_vm0, %v388_v2  ;;  %v910_v6 = vld [vmem:[%s1560_s2] ss:$0 sm:$0xff] }
  0x6d   : > { %934 = vmatprep.subr.mxu0 %v392_v1  ;;  %v913_v40 = vld [vmem:[%s1561_s3] ss:$0 sm:$0xff] }
  0x6e   : > { %935 = vmatpush3.msra.mxu0 %v392_v1  ;;  %v914_v42 = vld [vmem:[#allocation8] ss:$0 sm:$0xff] }
  0x6f   : > { %936 = vmatprep.subr.mxu0 %v391_v3 }
  0x70   : > { %937 = vmatpush3.msra.mxu0 %v391_v3 }
  0x71   : > { %938 = vmatprep.subr.mxu0 %v390_v4 }
  0x72   : > { %939 = vmatpush3.msra.mxu0 %v390_v4 }
  0x73   : > { %941 = vmatmul.mubr.msk.f32.vlgmr.msra.gmra.mxu0 %vm401_vm0, %v389_v5 }
 0x133   : > { %v942_v7 = vpop.f32.mrf.mxu0 }
 0x134   : > { %v480_v8 = vadd.f32 %v942_v7, %v910_v6 }
 0x135   : > { %v474_v9 = vpop.f32.mrf.mxu0 }
 0x136   : > { %v486_v10 = vmul.f32 0.70710677, %v480_v8  ;;  %v475_v11 = vadd.f32 %v910_v6, %v474_v9  ;;  %v484_v18 = vmul.f32 0.5, %v480_v8 }
 0x138   : > { %1045 = verf.f32 %v486_v10  ;;  %v485_v12 = vmul.f32 0.70710677, %v475_v11  ;;  %v483_v15 = vmul.f32 0.5, %v475_v11 }
 0x13a   : > { %1047 = verf.f32 %v485_v12 }
 0x145   : > { %v1046_v13 = vpop.eup %1045 }
 0x146   : > { %v490_v17 = vadd.f32 1.0, %v1046_v13 }
 0x147   : > { %v1048_v14 = vpop.eup %1047 }
 0x148   : > { %v489_v16 = vadd.f32 1.0, %v1048_v14  ;;  %v492_v21 = vmul.f32 %v490_v17, %v484_v18 }
 0x14a   : > { %v491_v19 = vmul.f32 %v489_v16, %v483_v15  ;;  %v496_v22 = vsel %vm401_vm0, %v492_v21, 0.0 }
 0x14c   : > { %v493_v20 = vsel %vm401_vm0, %v491_v19, 0.0 }
 0x14d   : > { %494 = vadd.xlane.f32.xlu0 %v493_v20 }
 0x151   : > { %497 = vadd.xlane.f32.xlu0 %v496_v22 }
 0x1d6   : > { %v495_v23 = vpop.xlane.xlu0 %494 }
 0x1d7   : > { %v500_v24 = vmul.f32 0.03125, %v495_v23 }
 0x1d9   : > { %v502_v25 = vsub.f32 %v491_v19, %v500_v24 }
 0x1da   : > { %v498_v26 = vpop.xlane.xlu0 %497 }
 0x1db   : > { %v501_v27 = vmul.f32 0.03125, %v498_v26  ;;  %v504_v28 = vmul.f32 %v502_v25, %v502_v25 }
 0x1dd   : > { %v503_v29 = vsub.f32 %v492_v21, %v501_v27  ;;  %v506_v30 = vsel %vm401_vm0, %v504_v28, 0.0 }
 0x1de   : > { %507 = vadd.xlane.f32.xlu1 %v506_v30 }
 0x1df   : > { %v505_v31 = vmul.f32 %v503_v29, %v503_v29 }
 0x1e1   : > { %v509_v32 = vsel %vm401_vm0, %v505_v31, 0.0 }
 0x1e2   : > { %510 = vadd.xlane.f32.xlu1 %v509_v32 }
 0x267   : > { %v508_v33 = vpop.xlane.xlu1 %507 }
 0x268   : > { %v512_v34 = vmul.f32 0.03125, %v508_v33 }
 0x26a   : > { %v514_v35 = vadd.f32 1e-12, %v512_v34 }
 0x26b   : > { %v511_v36 = vpop.xlane.xlu1 %510 }
 0x26c   : > { %1049 = vrsqrt.f32 %v514_v35  ;;  %v513_v37 = vmul.f32 0.03125, %v511_v36 }
 0x26e   : > { %v515_v38 = vadd.f32 1e-12, %v513_v37 }
 0x270   : > { %1051 = vrsqrt.f32 %v515_v38 }
 0x279   : > { %v1050_v39 = vpop.eup %1049 }
 0x27a   : > { %v518_v41 = vmul.f32 %v1050_v39, %v502_v25 }
 0x27c   : > { %v527_v43 = vmul.f32 %v913_v40, %v518_v41 }
 0x27d   : > { %v1052_v44 = vpop.eup %1051 }
 0x27e   : > { %v536_v45 = vadd.f32 %v914_v42, %v527_v43  ;;  %v519_v46 = vmul.f32 %v1052_v44, %v503_v29 }
 0x280   : > { %538 = vst.msk [vmem:[#allocation2] sm:$0xff] %vm401_vm0, %v536_v45  ;;  %v528_v47 = vmul.f32 %v913_v40, %v519_v46 }
 0x282   : > { %v537_v48 = vadd.f32 %v914_v42, %v528_v47 }
 0x284   : > { %539 = vst.msk [vmem:[#allocation2 + $0x8] sm:$0xff] %vm401_vm0, %v537_v48 }
 0x285 PF: > { %v555_v49 = vld [vmem:[%s1443_s29 + $0x68] sm:$0xff]  ;;  %v557_v50 = vld [vmem:[%s1443_s29 + $0x78] sm:$0xff]  ;;  %v554_v51 = vld [vmem:[%s1443_s29 + $0x60] sm:$0xff]  ;;  %vm580_vm1 = vcmask 261120   ;;  %v1258_v2 = vmov 0.0   ;;  %v560_v4 = vlaneseq  ;;  %s925_s19 = sshll.u32 %s1239_s27, 9 }
 0x286   : > { %611 = vmatprep.subr.mxu0 %v555_v49  ;;  %688 = vmatprep.subr.mxu1 %v557_v50  ;;  %v556_v52 = vld [vmem:[%s1443_s29 + $0x70] sm:$0xff]  ;;  %v551_v53 = vld [vmem:[%s1443_s29 + $0x48] sm:$0xff]  ;;  %v553_v54 = vld [vmem:[%s1443_s29 + $0x58] sm:$0xff]  ;;  %s766_s21 = sshll.u32 %s1457_s8, 4  ;;  %s1504_s27 = scalar_lea.hbm %s1565_s7, %s925_s19  ;;  %s1506_s21 = int_to_ptr.vmem [resolvable:$true] %s766_s21 }
 0x287   : > { %612 = vmatpush1.msra.mxu0 %v554_v51  ;;  %689 = vmatpush1.msra.mxu1 %v556_v52  ;;  %v550_v55 = vld [vmem:[%s1443_s29 + $0x40] sm:$0xff]  ;;  %v552_v56 = vld [vmem:[%s1443_s29 + $0x50] sm:$0xff]  ;;  %v547_v57 = vld [vmem:[%s1443_s29 + $0x28] sm:$0xff]  ;;  %v561_v5 = vshrl.u32 %v560_v4, 7  ;;  %s750_s1 = scalar_lea.sflag [#allocation5], %s1439_s4  ;;  %p1590_p7 = scmp.ne.s32.totalorder %s1579_s12, 0 }
 0x288   : > { %613 = vmatprep.subr.mxu0 %v551_v53  ;;  %690 = vmatprep.subr.mxu1 %v553_v54  ;;  %v549_v58 = vld [vmem:[%s1443_s29 + $0x38] sm:$0xff]  ;;  %v546_v59 = vld [vmem:[%s1443_s29 + $0x20] sm:$0xff]  ;;  %v548_v60 = vld [vmem:[%s1443_s29 + $0x30] sm:$0xff]  ;;  %s1259_s13 = smov [#allocation11]  }
 0x289   : > { %614 = vmatpush1.msra.mxu0 %v550_v55  ;;  %691 = vmatpush1.msra.mxu1 %v552_v56  ;;  %v543_v61 = vld [vmem:[%s1443_s29 + $0x8] sm:$0xff]  ;;  %v545_v62 = vld [vmem:[%s1443_s29 + $0x18] sm:$0xff]  ;;  %v542_v63 = vld [vmem:[%s1443_s29] sm:$0xff]  ;;  %v562_v6 = vsub.s32 0, %v561_v5  ;;  %v570_v7 = vsub.s32 2, %v561_v5  ;;  %v566_v9 = vsub.s32 1, %v561_v5 }
 0x28a   : > { %615 = vmatprep.subr.mxu0 %v547_v57  ;;  %692 = vmatprep.subr.mxu1 %v549_v58  ;;  %v544_v0 = vld [vmem:[%s1443_s29 + $0x10] sm:$0xff]  ;;  %v540_v1 = vld [vmem:[#allocation2] sm:$0xff]  ;;  %v574_v10 = vsub.s32 3, %v561_v5  ;;  %s1159_s29 = scalar_lea.vmem %s1506_s21, 1024  ;;  %s1163_s9 = sshll.u32 %s1259_s13, 4  ;;  %s1164_s9 = int_to_ptr.vmem [resolvable:$false] %s1163_s9 }
 0x28b   : > { %616 = vmatpush1.msra.mxu0 %v546_v59  ;;  %693 = vmatpush1.msra.mxu1 %v548_v60  ;;  %v541_v3 = vld [vmem:[#allocation2 + $0x8] sm:$0xff]  ;;  %v558_v8 = vld [vmem:[%s380_s20] sm:$0xf]  ;;  %p1160_p6 = scmp.ne.s32.totalorder %s1506_s21, %s1159_s29  ;;  %s1165_s14 = scalar_lea.vmem %s1164_s9, 2048 }
 0x28c   : > { %617 = vmatprep.subr.mxu0 %v543_v61  ;;  %694 = vmatprep.subr.mxu1 %v545_v62  ;;  %v563_v11 = vrot.slane %v558_v8, %v562_v6  ;;  %v571_v12 = vrot.slane %v558_v8, %v570_v7  ;;  %v567_v13 = vrot.slane %v558_v8, %v566_v9  ;;  %p1166_p9 = scmp.lt.s32.totalorder %s1506_s21, %s1164_s9  ;;  %p1167_p11 = scmp.lt.s32.totalorder %s1165_s14, %s1159_s29 }
 0x28d   : > { %618 = vmatpush1.msra.mxu0 %v542_v63  ;;  %651 = vmatprep.mubr.f32.mxu0 %v1258_v2  ;;  %v575_v14 = vrot.slane %v558_v8, %v574_v10  ;;  %p1161_p13 = pnand %p1160_p6, %p1590_p7 }
 0x28e   : > { %695 = vmatpush1.msra.mxu1 %v544_v0  ;;  %728 = vmatprep.mubr.f32.mxu1 %v1258_v2  ;;  %p1168_p1 = por %p1167_p11, %p1166_p9 }
 0x28f   : > { %915 = vmatmul.mubr.msk.f32.vlgmr.msra.gmra.mxu0 %vm580_vm1, %v540_v1  ;;  %917 = vmatmul.mubr.msk.f32.vlgmr.msra.gmra.mxu1 %vm580_vm1, %v540_v1  ;;  %p1162_p5 = pneg %p1161_p13 }
 0x290   : > { %657 = vmatprep.mubr.f32.mxu0 %v1258_v2  ;;  %734 = vmatprep.mubr.f32.mxu1 %v1258_v2 }
 0x291   : > { %p1169_p4 = pnand %p1168_p1, %p1162_p5 }
 0x293   : > { %916 = vmatmul.mubr.msk.f32.gmra.mxu0 %vm580_vm1, %v541_v3  ;;  %918 = vmatmul.mubr.msk.f32.gmra.mxu1 %vm580_vm1, %v541_v3 }
 0x34f   : > { %v653_v15 = vpop.f32.mrf.mxu0  ;;  %v730_v16 = vpop.f32.mrf.mxu1 }
 0x350   : > { %v654_v17 = vadd.f32 %v653_v15, %v563_v11  ;;  %v731_v18 = vadd.f32 %v730_v16, %v571_v12 }
 0x351   : > { %v655_v19 = vpop.f32.mrf.mxu0  ;;  %v732_v20 = vpop.f32.mrf.mxu1 }
 0x352   : > { %741 = vst [vmem:[%s1457_s8] sm:$0xff] %v654_v17  ;;  %743 = vst [vmem:[%s1457_s8 + $0x10] sm:$0xff] %v731_v18  ;;  %v656_v21 = vadd.f32 %v655_v19, %v567_v13  ;;  %v733_v22 = vadd.f32 %v732_v20, %v575_v14 }
 0x353   : > { %v659_v23 = vpop.f32.mrf.mxu0  ;;  %v736_v24 = vpop.f32.mrf.mxu1 }
 0x354   : > { %742 = vst [vmem:[%s1457_s8 + $0x8] sm:$0xff] %v656_v21  ;;  %744 = vst [vmem:[%s1457_s8 + $0x18] sm:$0xff] %v733_v22  ;;  %v660_v25 = vadd.f32 %v659_v23, %v563_v11  ;;  %v737_v26 = vadd.f32 %v736_v24, %v571_v12 }
 0x355   : > { %v661_v27 = vpop.f32.mrf.mxu0  ;;  %v738_v28 = vpop.f32.mrf.mxu1 }
 0x356   : > { %745 = vst [vmem:[%s1457_s8 + $0x20] sm:$0xff] %v660_v25  ;;  %747 = vst [vmem:[%s1457_s8 + $0x30] sm:$0xff] %v737_v26  ;;  %v662_v29 = vadd.f32 %v661_v27, %v567_v13  ;;  %v739_v30 = vadd.f32 %v738_v28, %v575_v14 }
 0x358   : > { %746 = vst [vmem:[%s1457_s8 + $0x28] sm:$0xff] %v662_v29  ;;  %748 = vst [vmem:[%s1457_s8 + $0x38] sm:$0xff] %v739_v30 }
 0x359   : > { %1172 = shalt.err (!%p1169_p4)
}
 0x35a   : > { %s1173_s18 = scalar_lea.hbm %s1504_s27, 1024  ;;  %s1177_s11 = scalar_lea.hbm %s1565_s7, 2048 }
 0x35b   : > { %p1174_p0 = scmp.ne.s32.totalorder %s1504_s27, %s1173_s18  ;;  %p1178_p12 = scmp.lt.s32.totalorder %s1504_s27, %s1565_s7 }
 0x35c   : > { %p1179_p3 = scmp.lt.s32.totalorder %s1177_s11, %s1173_s18 }
 0x35d   : > { %p1175_p10 = pnand %p1174_p0, %p1590_p7 }
 0x35e   : > { %p1180_p2 = por %p1179_p3, %p1178_p12 }
 0x35f   : > { %p1176_p8 = pneg %p1175_p10 }
 0x361   : > { %p1181_p6 = pnand %p1180_p2, %p1176_p8 }
 0x363   : > { %1184 = shalt.err (!%p1181_p6)
}
 0x364   : > { %s1260_s30 = smov 512   ;;  %s1261_s10 = smov 1024  }
 0x365   : > { %s1262_s15 = smov 32  }
 0x366   : > { %957 = dma.vmem_to_hbm [thread:$0]  (%p1590_p7), %s1506_s21, 1024, %s1504_s27, %s750_s1, %s1260_s30, %s1261_s10, %s1262_s15  }
 0x367 PF: > { %s1591_s19 = sld [smem:[#allocation17_spill]]  ;;  %s781_s0 = sand.u32 1, %s1227_s24  }
 0x368   : > { %s1592_s17 = sld [smem:[#allocation16_spill]]  ;;  %s782_s29 = scalar_lea.sflag [#allocation5], %s781_s0 }
 0x36d   : > { %p1593_p13 = scmp.ne.s32.totalorder %s1591_s19, 0 }
 0x36e   : > { %p1594_p5 = scmp.ge.s32.totalorder %s1592_s17, 2 }
 0x370   : > { %p974_p9 = pnand %p1594_p5, %p1593_p13 }
 0x372   : > { %p975_p11 = pneg %p974_p9 }
 0x374   : > { %1222 = dma.done.wait (%p975_p11), %s782_s29, 1024  }
 0x375   : > { %1224 = vsyncadd (%p975_p11), %s782_s29, 4294966272  ;;  %s25_s29 = sadd.s32 1, %s1592_s17   ;;  %s1595_s12 = sld [smem:[#allocation18_spill]] }
 0x376   : > { %p22_p1 = scmp.ge.s32.totalorder %s25_s29, 4   ;;  %s1596_s24 = smov %s1231_s25 }
 0x377   : > { %s1597_s25 = smov %s1235_s26  ;;  %s1598_s26 = smov %s1422_s22 }
 0x378   : > { %s1599_s27 = smov %s1243_s28  ;;  %24 = sbr.rel (!%p22_p1) target bundleno = 12 (0xc), region = 114 }
 0x37b   : > { %s1600_s28 = smov %s1595_s12 }
 0x37d   :  { %787 = vsyncpa [#allocation4], 1 }
 0x37e   :  { %789 = vsyncpa [#allocation4 + $0x1], 1 }
 0x37f   :  { %790 = vsyncpa [#allocation7], 1 }
 0x380   :  { %791 = vsyncpa [#allocation10], 1 }
 0x381   :  { %793 = vsyncpa [#allocation10 + $0x1], 1 }
 0x382   :  { %794 = vsyncpa [#allocation5], 1 }
 0x383   :  { %796 = vsyncpa [#allocation5 + $0x1], 1 }

</bundles_post_ra>
